<compile_context>
chip_gen: v7x
topology: tpu7x:2x2x1
jax: 0.10.0
libtpu: 0.0.40
codegen_flags: <defaults>
</compile_context>

<pallas_src>
import functools

import jax
import jax.numpy as jnp
from jax.experimental import pallas as pl
from jax.experimental.pallas import tpu as pltpu


def _leaky_relu(x, slope=0.2):
    # max(x, slope*x) == LeakyReLU for 0 < slope < 1; one mul + one max.
    return jnp.maximum(x, slope * x)


def hsi2a_kernel(x_ref,
                 w1_ref, b1_ref,
                 w2_ref, b2_ref,
                 w3_ref, b3_ref,
                 w4_ref, b4_ref,
                 o_ref,
                 *, compute_dtype, epilogue_dtype):
    # x_ref: (C_in, TILE) pixel tile (channel-major, pixels on lanes).
    # wN_ref: (out, in) weights; bN_ref: (out, 1) biases. All resident in VMEM.
    x = x_ref[...].astype(jnp.float32)              # (C_in, T)
    c_in = x.shape[0]

    # ---- Layer 1: K = C_in (tiny, e.g. 4) -> VPU broadcast FMAs, not MXU.
    w1 = w1_ref[...]                                 # (n1, C_in) f32
    h = b1_ref[...] + w1[:, 0:1] * x[0:1, :]         # (n1, T)
    for c in range(1, c_in):
        h = h + w1[:, c:c + 1] * x[c:c + 1, :]
    h = _leaky_relu(h).astype(compute_dtype)         # fused max + cast pass

    # ---- Layer 2: MXU matmul, f32 accumulation, epilogue in epilogue_dtype.
    h = jnp.dot(w2_ref[...], h, preferred_element_type=jnp.float32)
    h = _leaky_relu(h.astype(epilogue_dtype) + b2_ref[...]).astype(compute_dtype)

    # ---- Layer 3
    h = jnp.dot(w3_ref[...], h, preferred_element_type=jnp.float32)
    h = _leaky_relu(h.astype(epilogue_dtype) + b3_ref[...]).astype(compute_dtype)

    # ---- Layer 4 + clamp (useClamp=True branch of the PyTorch module).
    h = jnp.dot(w4_ref[...], h, preferred_element_type=jnp.float32) + b4_ref[...]
    o_ref[...] = jnp.clip(h, 0.0, 1.0).astype(o_ref.dtype)


def _bf16_valu_ok():
    """Packed bf16 VALU exists on v6e/v7x; not on v5e and older chips."""
    try:
        kind = jax.devices()[0].device_kind.lower()
    except Exception:
        return False
    return not any(t in kind for t in ("v2", "v3", "v4", "v5"))


def _choose_tile(hw, batch, requested, target_steps=8):
    """Lane-dense (multiple-of-128) pixel tile.

    Targets >= target_steps total grid steps (two-TC utilization on v7x,
    per-step overhead amortization) and prefers a tile that divides hw exactly
    (no ragged tail block) if one exists near the chosen size.
    """
    rounded_hw = -(-hw // 128) * 128
    tile = min(max(128, (requested // 128) * 128), rounded_hw)
    while tile > 128 and batch * (-(-hw // tile)) < target_steps:
        tile -= 128
    # Prefer an exact divisor not much smaller than the chosen size.
    for cand in range(tile, max(127, tile // 2 - 1), -128):
        if hw % cand == 0:
            return cand
    return tile


def hsi2a_forward(x_nchw, params, *, tn=2048, compute_dtype=jnp.bfloat16,
                  bf16_epilogue=None):
    """x_nchw: [B, C_in, H, W]; params: w{i} as [out, in], b{i} as [out]."""
    B, C_in, H, W = x_nchw.shape
    hw = H * W

    if bf16_epilogue is None:
        bf16_epilogue = (jnp.dtype(compute_dtype) == jnp.dtype(jnp.bfloat16)
                         and _bf16_valu_ok())
    epilogue_dtype = jnp.bfloat16 if bf16_epilogue else jnp.float32

    # Layer-1 weights/bias stay f32 (VPU path; v5e VPU has no bf16 anyway).
    w1 = params["w1"].astype(jnp.float32)
    w2 = params["w2"].astype(compute_dtype)
    w3 = params["w3"].astype(compute_dtype)
    w4 = params["w4"].astype(compute_dtype)
    b1 = params["b1"].astype(jnp.float32).reshape(-1, 1)
    b2 = params["b2"].astype(epilogue_dtype).reshape(-1, 1)
    b3 = params["b3"].astype(epilogue_dtype).reshape(-1, 1)
    b4 = params["b4"].astype(jnp.float32).reshape(-1, 1)
    C_out = w4.shape[0]

    tile = _choose_tile(hw, B, tn)
    n_tiles = pl.cdiv(hw, tile)   # ragged tail handled by Pallas boundary blocks

    # NCHW -> [B, C, H*W] is a free reshape (no transpose, no HBM copy).
    x = x_nchw.reshape(B, C_in, hw)

    # Per-step VMEM estimate; raise the scoped limit only if it would bind.
    n1, n2, n3 = w1.shape[0], w2.shape[0], w3.shape[0]
    est = 2 * ((n1 + n2 + n3) * tile * 4            # elementwise intermediates
               + 2 * (C_in + C_out) * tile * 4)     # double-buffered x/out tiles
    est += 1 << 20                                  # weights + misc headroom
    vmem_limit = int(min(est, 64 << 20)) if est > (16 << 20) else None

    full = lambda arr: pl.BlockSpec(arr.shape, lambda b, j: (0, 0))
    kernel = functools.partial(hsi2a_kernel, compute_dtype=compute_dtype,
                               epilogue_dtype=epilogue_dtype)

    out = pl.pallas_call(
        kernel,
        out_shape=jax.ShapeDtypeStruct((B, C_out, hw), x_nchw.dtype),
        grid_spec=pltpu.PrefetchScalarGridSpec(
            num_scalar_prefetch=0,
            grid=(B, n_tiles),
            in_specs=[
                pl.BlockSpec((None, C_in, tile), lambda b, j: (b, 0, j)),
                full(w1), full(b1),
                full(w2), full(b2),
                full(w3), full(b3),
                full(w4), full(b4),
            ],
            out_specs=pl.BlockSpec((None, C_out, tile), lambda b, j: (b, 0, j)),
        ),
        compiler_params=pltpu.CompilerParams(
            dimension_semantics=("parallel", "parallel"),
            vmem_limit_bytes=vmem_limit),
    )(x, w1, b1, w2, b2, w3, b3, w4, b4)

    return out.reshape(B, C_out, H, W)


def init_params(key, input_c, output_c, ngf):
    """Deterministic synthetic weights. Stored as [out, in] (conv-style)."""
    dims = [input_c, ngf * 2, ngf * 4, ngf * 8, output_c]
    params = {}
    for layer in range(4):
        key, kw, kb = jax.random.split(key, 3)
        fan_in = dims[layer]
        scale = 1.0 / (fan_in ** 0.5)
        params[f"w{layer + 1}"] = jax.random.uniform(
            kw, (dims[layer + 1], dims[layer]), jnp.float32, -scale, scale)
        params[f"b{layer + 1}"] = jax.random.uniform(
            kb, (dims[layer + 1],), jnp.float32, -scale, scale)
    return params


def hsi2a_reference(x_nchw, params):
    """Plain-JAX f32 reference of the same forward pass (for validation)."""
    B, C, H, W = x_nchw.shape
    h = x_nchw.reshape(B, C, H * W).astype(jnp.float32)
    for layer in range(1, 5):
        w = params[f"w{layer}"].astype(jnp.float32)             # (out, in)
        b = params[f"b{layer}"].astype(jnp.float32).reshape(1, -1, 1)
        h = jnp.einsum("oi,biN->boN", w, h) + b
        if layer < 4:
            h = jnp.where(h > 0, h, 0.2 * h)
    h = jnp.clip(h, 0.0, 1.0)
    return h.reshape(B, -1, H, W).astype(x_nchw.dtype)


if __name__ == "__main__":
    key = jax.random.PRNGKey(0)
    k_params, k_x, k_x2 = jax.random.split(key, 3)

    # Small shapes consistent with the module: input_c=4, output_c=3, ngf=16
    B, C_in, H, W = 2, 4, 16, 16
    ngf, C_out = 16, 3

    params = init_params(k_params, C_in, C_out, ngf)
    x = jax.random.normal(k_x, (B, C_in, H, W), jnp.float32)

    ref = jax.block_until_ready(hsi2a_reference(x, params))

    # Exact path (f32 MXU operands, f32 epilogues) — tight tolerance.
    out_f32 = jax.block_until_ready(
        hsi2a_forward(x, params, compute_dtype=jnp.float32))
    assert out_f32.shape == (B, C_out, H, W)
    assert float(jnp.max(jnp.abs(out_f32 - ref))) < 1e-5

    # Fast path (bf16 MXU operands; bf16 epilogues on v6e/v7x).
    out_bf16 = jax.block_until_ready(
        hsi2a_forward(x, params, compute_dtype=jnp.bfloat16))
    assert out_bf16.shape == (B, C_out, H, W)
    assert float(jnp.max(jnp.abs(out_bf16 - ref))) < 5e-2

    # Ragged spatial size (H*W not a multiple of the 128-lane tile): exercises
    # the in-kernel boundary handling that replaced the wrapper pad + slice.
    Hr = Wr = 10
    xr = jax.random.normal(k_x2, (B, C_in, Hr, Wr), jnp.float32)
    ref_r = jax.block_until_ready(hsi2a_reference(xr, params))
    out_r = jax.block_until_ready(
        hsi2a_forward(xr, params, compute_dtype=jnp.float32))
    assert out_r.shape == (B, C_out, Hr, Wr)
    assert float(jnp.max(jnp.abs(out_r - ref_r))) < 1e-5

    print("KERNEL_OK")
</pallas_src>

<mosaic_0001>
module attributes {stable_mosaic.version = 11 : i64} {
  func.func @hsi2a_kernel(%arg0: i32, %arg1: i32, %arg2: memref<1x4x128xf32, #tpu.memory_space<vmem>>, %arg3: memref<32x4xf32, #tpu.memory_space<vmem>>, %arg4: memref<32x1xf32, #tpu.memory_space<vmem>>, %arg5: memref<64x32xf32, #tpu.memory_space<vmem>>, %arg6: memref<64x1xf32, #tpu.memory_space<vmem>>, %arg7: memref<128x64xf32, #tpu.memory_space<vmem>>, %arg8: memref<128x1xf32, #tpu.memory_space<vmem>>, %arg9: memref<3x128xf32, #tpu.memory_space<vmem>>, %arg10: memref<3x1xf32, #tpu.memory_space<vmem>>, %arg11: memref<1x3x128xf32, #tpu.memory_space<vmem>>) attributes {dimension_semantics = [#tpu.dimension_semantics<parallel>, #tpu.dimension_semantics<parallel>], iteration_bounds = array<i64: 2, 2>, scalar_prefetch = 0 : i64, scratch_operands = 0 : i64, tpu.core_type = #tpu.core_type<tc>, window_params = [{transform_indices = @transform_0, window_bounds = array<i64: 1, 4, 128>}, {pipeline_mode = #tpu.pipeline_mode<synchronous>, transform_indices = @transform_1, window_bounds = array<i64: 32, 4>}, {pipeline_mode = #tpu.pipeline_mode<synchronous>, transform_indices = @transform_2, window_bounds = array<i64: 32, 1>}, {pipeline_mode = #tpu.pipeline_mode<synchronous>, transform_indices = @transform_3, window_bounds = array<i64: 64, 32>}, {pipeline_mode = #tpu.pipeline_mode<synchronous>, transform_indices = @transform_4, window_bounds = array<i64: 64, 1>}, {pipeline_mode = #tpu.pipeline_mode<synchronous>, transform_indices = @transform_5, window_bounds = array<i64: 128, 64>}, {pipeline_mode = #tpu.pipeline_mode<synchronous>, transform_indices = @transform_6, window_bounds = array<i64: 128, 1>}, {pipeline_mode = #tpu.pipeline_mode<synchronous>, transform_indices = @transform_7, window_bounds = array<i64: 3, 128>}, {pipeline_mode = #tpu.pipeline_mode<synchronous>, transform_indices = @transform_8, window_bounds = array<i64: 3, 1>}, {transform_indices = @transform_9, window_bounds = array<i64: 1, 3, 128>}]} {
    %c0 = arith.constant 0 : index
    %c0_0 = arith.constant 0 : index
    %c0_1 = arith.constant 0 : index
    %0 = vector.load %arg2[%c0, %c0_0, %c0_1] : memref<1x4x128xf32, #tpu.memory_space<vmem>>, vector<1x4x128xf32>
    %1 = vector.shape_cast %0 : vector<1x4x128xf32> to vector<4x128xf32>
    %c0_2 = arith.constant 0 : index
    %c0_3 = arith.constant 0 : index
    %2 = vector.load %arg3[%c0_2, %c0_3] : memref<32x4xf32, #tpu.memory_space<vmem>>, vector<32x4xf32>
    %c0_4 = arith.constant 0 : index
    %c0_5 = arith.constant 0 : index
    %3 = vector.load %arg4[%c0_4, %c0_5] : memref<32x1xf32, #tpu.memory_space<vmem>>, vector<32x1xf32>
    %4 = vector.extract_strided_slice %2 {offsets = [0, 0], sizes = [32, 1], strides = [1, 1]} : vector<32x4xf32> to vector<32x1xf32>
    %5 = vector.extract_strided_slice %1 {offsets = [0, 0], sizes = [1, 128], strides = [1, 1]} : vector<4x128xf32> to vector<1x128xf32>
    %6 = vector.broadcast %4 : vector<32x1xf32> to vector<32x128xf32>
    %7 = vector.broadcast %5 : vector<1x128xf32> to vector<32x128xf32>
    %8 = arith.mulf %6, %7 : vector<32x128xf32>
    %9 = vector.broadcast %3 : vector<32x1xf32> to vector<32x128xf32>
    %10 = arith.addf %9, %8 : vector<32x128xf32>
    %11 = vector.extract_strided_slice %2 {offsets = [0, 1], sizes = [32, 1], strides = [1, 1]} : vector<32x4xf32> to vector<32x1xf32>
    %12 = vector.extract_strided_slice %1 {offsets = [1, 0], sizes = [1, 128], strides = [1, 1]} : vector<4x128xf32> to vector<1x128xf32>
    %13 = vector.broadcast %11 : vector<32x1xf32> to vector<32x128xf32>
    %14 = vector.broadcast %12 : vector<1x128xf32> to vector<32x128xf32>
    %15 = arith.mulf %13, %14 : vector<32x128xf32>
    %16 = arith.addf %10, %15 : vector<32x128xf32>
    %17 = vector.extract_strided_slice %2 {offsets = [0, 2], sizes = [32, 1], strides = [1, 1]} : vector<32x4xf32> to vector<32x1xf32>
    %18 = vector.extract_strided_slice %1 {offsets = [2, 0], sizes = [1, 128], strides = [1, 1]} : vector<4x128xf32> to vector<1x128xf32>
    %19 = vector.broadcast %17 : vector<32x1xf32> to vector<32x128xf32>
    %20 = vector.broadcast %18 : vector<1x128xf32> to vector<32x128xf32>
    %21 = arith.mulf %19, %20 : vector<32x128xf32>
    %22 = arith.addf %16, %21 : vector<32x128xf32>
    %23 = vector.extract_strided_slice %2 {offsets = [0, 3], sizes = [32, 1], strides = [1, 1]} : vector<32x4xf32> to vector<32x1xf32>
    %24 = vector.extract_strided_slice %1 {offsets = [3, 0], sizes = [1, 128], strides = [1, 1]} : vector<4x128xf32> to vector<1x128xf32>
    %25 = vector.broadcast %23 : vector<32x1xf32> to vector<32x128xf32>
    %26 = vector.broadcast %24 : vector<1x128xf32> to vector<32x128xf32>
    %27 = arith.mulf %25, %26 : vector<32x128xf32>
    %28 = arith.addf %22, %27 : vector<32x128xf32>
    %cst = arith.constant 2.000000e-01 : f32
    %29 = vector.broadcast %cst : f32 to vector<32x128xf32>
    %30 = arith.mulf %29, %28 : vector<32x128xf32>
    %31 = arith.maximumf %28, %30 : vector<32x128xf32>
    %c0_6 = arith.constant 0 : index
    %c0_7 = arith.constant 0 : index
    %32 = vector.load %arg5[%c0_6, %c0_7] : memref<64x32xf32, #tpu.memory_space<vmem>>, vector<64x32xf32>
    %cst_8 = arith.constant dense<0.000000e+00> : vector<64x128xf32>
    %33 = tpu.matmul %32, %31, %cst_8 {dimension_numbers = #tpu.dot_dimension_numbers<[1], [0], [0], [1], [0, 0, 1, 1], [], []>} : vector<64x32xf32>, vector<32x128xf32>, vector<64x128xf32> -> vector<64x128xf32>
    %c0_9 = arith.constant 0 : index
    %c0_10 = arith.constant 0 : index
    %34 = vector.load %arg6[%c0_9, %c0_10] : memref<64x1xf32, #tpu.memory_space<vmem>>, vector<64x1xf32>
    %35 = vector.broadcast %34 : vector<64x1xf32> to vector<64x128xf32>
    %36 = arith.addf %33, %35 : vector<64x128xf32>
    %cst_11 = arith.constant 2.000000e-01 : f32
    %37 = vector.broadcast %cst_11 : f32 to vector<64x128xf32>
    %38 = arith.mulf %37, %36 : vector<64x128xf32>
    %39 = arith.maximumf %36, %38 : vector<64x128xf32>
    %c0_12 = arith.constant 0 : index
    %c0_13 = arith.constant 0 : index
    %40 = vector.load %arg7[%c0_12, %c0_13] : memref<128x64xf32, #tpu.memory_space<vmem>>, vector<128x64xf32>
    %cst_14 = arith.constant dense<0.000000e+00> : vector<128x128xf32>
    %41 = tpu.matmul %40, %39, %cst_14 {dimension_numbers = #tpu.dot_dimension_numbers<[1], [0], [0], [1], [0, 0, 1, 1], [], []>} : vector<128x64xf32>, vector<64x128xf32>, vector<128x128xf32> -> vector<128x128xf32>
    %c0_15 = arith.constant 0 : index
    %c0_16 = arith.constant 0 : index
    %42 = vector.load %arg8[%c0_15, %c0_16] : memref<128x1xf32, #tpu.memory_space<vmem>>, vector<128x1xf32>
    %43 = vector.broadcast %42 : vector<128x1xf32> to vector<128x128xf32>
    %44 = arith.addf %41, %43 : vector<128x128xf32>
    %cst_17 = arith.constant 2.000000e-01 : f32
    %45 = vector.broadcast %cst_17 : f32 to vector<128x128xf32>
    %46 = arith.mulf %45, %44 : vector<128x128xf32>
    %47 = arith.maximumf %44, %46 : vector<128x128xf32>
    %c0_18 = arith.constant 0 : index
    %c0_19 = arith.constant 0 : index
    %48 = vector.load %arg9[%c0_18, %c0_19] : memref<3x128xf32, #tpu.memory_space<vmem>>, vector<3x128xf32>
    %cst_20 = arith.constant dense<0.000000e+00> : vector<3x128xf32>
    %49 = tpu.matmul %48, %47, %cst_20 {dimension_numbers = #tpu.dot_dimension_numbers<[1], [0], [0], [1], [0, 0, 1, 1], [], []>} : vector<3x128xf32>, vector<128x128xf32>, vector<3x128xf32> -> vector<3x128xf32>
    %c0_21 = arith.constant 0 : index
    %c0_22 = arith.constant 0 : index
    %50 = vector.load %arg10[%c0_21, %c0_22] : memref<3x1xf32, #tpu.memory_space<vmem>>, vector<3x1xf32>
    %51 = vector.broadcast %50 : vector<3x1xf32> to vector<3x128xf32>
    %52 = arith.addf %49, %51 : vector<3x128xf32>
    %cst_23 = arith.constant 0.000000e+00 : f32
    %cst_24 = arith.constant 1.000000e+00 : f32
    %53 = vector.broadcast %cst_23 : f32 to vector<3x128xf32>
    %54 = arith.maximumf %53, %52 : vector<3x128xf32>
    %55 = vector.broadcast %cst_24 : f32 to vector<3x128xf32>
    %56 = arith.minimumf %55, %54 : vector<3x128xf32>
    %c0_25 = arith.constant 0 : index
    %c0_26 = arith.constant 0 : index
    %c0_27 = arith.constant 0 : index
    %57 = vector.load %arg11[%c0_25, %c0_26, %c0_27] : memref<1x3x128xf32, #tpu.memory_space<vmem>>, vector<1x3x128xf32>
    %58 = vector.shape_cast %57 : vector<1x3x128xf32> to vector<3x128xf32>
    %59 = vector.shape_cast %56 : vector<3x128xf32> to vector<1x3x128xf32>
    tpu.vector_store %arg11[%c0_25, %c0_26, %c0_27], %59 {strides = array<i32>} : memref<1x3x128xf32, #tpu.memory_space<vmem>>, vector<1x3x128xf32>,
    return
  }
  func.func @transform_0(%arg0: i32, %arg1: i32) -> (i32, i32, i32) {
    %c0_i32 = arith.constant 0 : i32
    %c0_i32_0 = arith.constant 0 : i32
    return %arg0, %c0_i32, %arg1 : i32, i32, i32
  }
  func.func @transform_1(%arg0: i32, %arg1: i32) -> (i32, i32) {
    %c0_i32 = arith.constant 0 : i32
    %c0_i32_0 = arith.constant 0 : i32
    %c0_i32_1 = arith.constant 0 : i32
    return %c0_i32, %c0_i32_0 : i32, i32
  }
  func.func @transform_2(%arg0: i32, %arg1: i32) -> (i32, i32) {
    %c0_i32 = arith.constant 0 : i32
    %c0_i32_0 = arith.constant 0 : i32
    %c0_i32_1 = arith.constant 0 : i32
    return %c0_i32, %c0_i32_0 : i32, i32
  }
  func.func @transform_3(%arg0: i32, %arg1: i32) -> (i32, i32) {
    %c0_i32 = arith.constant 0 : i32
    %c0_i32_0 = arith.constant 0 : i32
    %c0_i32_1 = arith.constant 0 : i32
    return %c0_i32, %c0_i32_0 : i32, i32
  }
  func.func @transform_4(%arg0: i32, %arg1: i32) -> (i32, i32) {
    %c0_i32 = arith.constant 0 : i32
    %c0_i32_0 = arith.constant 0 : i32
    %c0_i32_1 = arith.constant 0 : i32
    return %c0_i32, %c0_i32_0 : i32, i32
  }
  func.func @transform_5(%arg0: i32, %arg1: i32) -> (i32, i32) {
    %c0_i32 = arith.constant 0 : i32
    %c0_i32_0 = arith.constant 0 : i32
    %c0_i32_1 = arith.constant 0 : i32
    return %c0_i32, %c0_i32_0 : i32, i32
  }
  func.func @transform_6(%arg0: i32, %arg1: i32) -> (i32, i32) {
    %c0_i32 = arith.constant 0 : i32
    %c0_i32_0 = arith.constant 0 : i32
    %c0_i32_1 = arith.constant 0 : i32
    return %c0_i32, %c0_i32_0 : i32, i32
  }
  func.func @transform_7(%arg0: i32, %arg1: i32) -> (i32, i32) {
    %c0_i32 = arith.constant 0 : i32
    %c0_i32_0 = arith.constant 0 : i32
    %c0_i32_1 = arith.constant 0 : i32
    return %c0_i32, %c0_i32_0 : i32, i32
  }
  func.func @transform_8(%arg0: i32, %arg1: i32) -> (i32, i32) {
    %c0_i32 = arith.constant 0 : i32
    %c0_i32_0 = arith.constant 0 : i32
    %c0_i32_1 = arith.constant 0 : i32
    return %c0_i32, %c0_i32_0 : i32, i32
  }
  func.func @transform_9(%arg0: i32, %arg1: i32) -> (i32, i32, i32) {
    %c0_i32 = arith.constant 0 : i32
    %c0_i32_0 = arith.constant 0 : i32
    return %arg0, %c0_i32, %arg1 : i32, i32, i32
  }
}

</mosaic_0001>

<bundles_post_ra>
// kernel: tpu_custom_call.1
= control target key start
LH: loop header
LB: loop body
LE: loop exit
PB: predicated region body
PF: predicated region fallthrough
CT: control target
= control target key end

     0   :  { %s1612_s30 = smov 0   ;;  %s1614_s10 = smov 0   ;;  %s1884_s0 = inlined_call_operand.vmem [shape: f32[2,4,256], index: 0, kind: input, shape index: {}]   ;;  %s1885_s1 = inlined_call_operand.vmem [shape: f32[32,4], index: 1, kind: input, shape index: {}]   ;;  %s1886_s2 = inlined_call_operand.vmem [shape: f32[32,1], index: 2, kind: input, shape index: {}]   ;;  %s1887_s3 = inlined_call_operand.vmem [shape: f32[64,32], index: 3, kind: input, shape index: {}]   ;;  %s1888_s4 = inlined_call_operand.vmem [shape: f32[64,1], index: 4, kind: input, shape index: {}]   ;;  %s1889_s5 = inlined_call_operand.vmem [shape: f32[128,64], index: 5, kind: input, shape index: {}]   ;;  %s1890_s6 = inlined_call_operand.vmem [shape: f32[128,1], index: 6, kind: input, shape index: {}]   ;;  %s1891_s7 = inlined_call_operand.vmem [shape: f32[3,128], index: 7, kind: input, shape index: {}]   ;;  %s1892_s8 = inlined_call_operand.vmem [shape: f32[3,1], index: 8, kind: input, shape index: {}]   ;;  %s1893_s9 = inlined_call_operand.vmem [shape: f32[2,3,256], index: 9, kind: output, shape index: {}]  }
   0x1   :  { %s1616_s11 = smov 0   ;;  %s1618_s12 = smov 0  }
   0x2   :  { %s1620_s13 = smov 0  }
   0x3 LB: > { %s28_s14 = sadd.s32 1, %s1545_s11  ;;  %s31_s15 = sadd.s32 1, %s1549_s12  ;;  %s1553_s13 = sphi %s1620_s13, %s19_s13   ;;  %s1549_s12 = sphi %s1618_s12, %s1897_s12   ;;  %s1545_s11 = sphi %s1616_s11, %s1896_s11   ;;  %s1541_s10 = sphi %s1614_s10, %s1895_s10   ;;  %s1537_s30 = sphi %s1612_s30, %s1894_s30  }
   0x4   : > { %p29_p0 = scmp.ge.s32.totalorder %s28_s14, 2  ;;  %p1227_p1 = scmp.ge.s32.totalorder %s1553_s13, 1 }
   0x5   : > { %p306_p2 = scmp.lt.s32.totalorder %s1553_s13, 5 }
   0x6   : > { %s1899_s14 = smov (%p29_p0, %s28_s14), 0  ;;  %s1901_s15 = smov (!%p29_p0, %s31_s15), %s1549_s12 }
   0x7   : > { %p307_p3 = pnand %p1227_p1, %p306_p2  ;;  %p33_p4 = scmp.ge.s32.totalorder %s1901_s15, 2 }
   0x8   : > { %v369_v0 = vld [vmem:[%s1886_s2] sm:$0xff] (!%p307_p3)  ;;  %v1555_v2 = vmov (!%p307_p3), 0   ;;  %v370_v3 = vld [vmem:[%s1886_s2 + $0x8] sm:$0xff] (!%p307_p3)  ;;  %v368_v5 = vld [vmem:[%s1885_s1 + $0x18] sm:$0xff] (!%p307_p3)  ;;  %v1556_v6 = vmov (!%p307_p3), 1   ;;  %v1557_v9 = vmov (!%p307_p3), 2   ;;  %v393_v44 = vlaneseq (!%p307_p3) }
   0x9   : > { %s1903_s15 = smov (%p33_p4, %s1901_s15), 0  ;;  %310 = sbr.rel (%p307_p3) target bundleno = 913 (0x391), region = 56 }
   0xa   : > { %v365_v1 = vld [vmem:[%s1885_s1] sm:$0xff] (!%p307_p3)  ;;  %1502 = vset.pattern.permute.xlu1 (!%p307_p3), %v1555_v2  ;;  %1501 = vset.pattern.permute.xlu0 (!%p307_p3), %v1555_v2  ;;  %v366_v4 = vld [vmem:[%s1885_s1 + $0x8] sm:$0xff] (!%p307_p3)  ;;  %v371_v7 = vld [vmem:[%s1886_s2 + $0x10] sm:$0xff] (!%p307_p3)  ;;  %v1558_v10 = vmov (!%p307_p3), 3   ;;  %vm573_vm0 = vcmask (!%p307_p3), 261120   ;;  %p348_p5 = scmp.lt.s32.totalorder (!%p307_p3), %s1541_s10, 1 }
   0xb   : > { %403 = vperm.xlu1 (!%p307_p3), %1502, %v369_v0   ;;  %375 = vperm.xlu0 (!%p307_p3), %1501, %v365_v1   ;;  %v367_v8 = vld [vmem:[%s1885_s1 + $0x10] sm:$0xff] (!%p307_p3)  ;;  %v372_v11 = vld [vmem:[%s1886_s2 + $0x18] sm:$0xff] (!%p307_p3)  ;;  %v517_v12 = vld [vmem:[%s1887_s3] sm:$0xff] (!%p307_p3)  ;;  %p350_p6 = scmp.lt.s32.totalorder (!%p307_p3), %s1537_s30, 1  ;;  %v394_v47 = vshrl.u32 (!%p307_p3), %v393_v44, 7  ;;  %vm831_vm1 = vcmask (!%p307_p3), 523264  }
   0xc   : > { %1319 = vmatprep.mubr.msk.f32.mxu0 (!%p307_p3), %vm573_vm0, %v517_v12  ;;  %v526_v13 = vld [vmem:[%s1888_s4 + $0x8] sm:$0xff] (!%p307_p3)  ;;  %v525_v14 = vld [vmem:[%s1888_s4] sm:$0xff] (!%p307_p3)  ;;  %v527_v15 = vld [vmem:[%s1888_s4 + $0x10] sm:$0xff] (!%p307_p3)  ;;  %vm1560_vm2 = vmmov (!%p307_p3), 0  }
   0xd   : > { %v528_v16 = vld [vmem:[%s1888_s4 + $0x18] sm:$0xff] (!%p307_p3)  ;;  %v529_v17 = vld [vmem:[%s1888_s4 + $0x20] sm:$0xff] (!%p307_p3)  ;;  %v530_v18 = vld [vmem:[%s1888_s4 + $0x28] sm:$0xff] (!%p307_p3)  ;;  %v395_v49 = vsub.s32 (!%p307_p3), 0, %v394_v47  ;;  %v443_v50 = vsub.s32 (!%p307_p3), 1, %v394_v47  ;;  %v471_v55 = vsub.s32 (!%p307_p3), 2, %v394_v47 }
   0xe   : > { %v531_v19 = vld [vmem:[%s1888_s4 + $0x30] sm:$0xff] (!%p307_p3)  ;;  %v532_v20 = vld [vmem:[%s1888_s4 + $0x38] sm:$0xff] (!%p307_p3)  ;;  %v735_v21 = vld [vmem:[%s1890_s6] sm:$0xff] (!%p307_p3)  ;;  %v499_v59 = vsub.s32 (!%p307_p3), 3, %v394_v47 }
   0xf   : > { %408 = vperm.xlu1 (!%p307_p3), %1502, %v370_v3   ;;  %380 = vperm.xlu0 (!%p307_p3), %1501, %v366_v4   ;;  %v736_v22 = vld [vmem:[%s1890_s6 + $0x8] sm:$0xff] (!%p307_p3)  ;;  %v737_v23 = vld [vmem:[%s1890_s6 + $0x10] sm:$0xff] (!%p307_p3)  ;;  %v738_v24 = vld [vmem:[%s1890_s6 + $0x18] sm:$0xff] (!%p307_p3) }
  0x10   : > { %v739_v25 = vld [vmem:[%s1890_s6 + $0x20] sm:$0xff]  ;;  %v740_v26 = vld [vmem:[%s1890_s6 + $0x28] sm:$0xff]  ;;  %v741_v27 = vld [vmem:[%s1890_s6 + $0x30] sm:$0xff]  ;;  %s1905_s10 = smov (!%p348_p5, %s1541_s10), 1  ;;  %s1907_s30 = smov (!%p350_p6, %s1537_s30), 1 }
  0x11   : > { %v742_v28 = vld [vmem:[%s1890_s6 + $0x38] sm:$0xff]  ;;  %v743_v29 = vld [vmem:[%s1890_s6 + $0x40] sm:$0xff]  ;;  %v744_v30 = vld [vmem:[%s1890_s6 + $0x48] sm:$0xff]  ;;  %s1228_s28 = sshll.u32 %s1905_s10, 1 }
  0x12   : > { %v745_v31 = vld [vmem:[%s1890_s6 + $0x50] sm:$0xff]  ;;  %v746_v32 = vld [vmem:[%s1890_s6 + $0x58] sm:$0xff]  ;;  %v747_v33 = vld [vmem:[%s1890_s6 + $0x60] sm:$0xff]  ;;  %s1753_s29 = sadd.s32 %s1228_s28, %s1907_s30 }
  0x13   : > { %1503 = vset.pattern.permute.xlu1 %v1556_v6  ;;  %390 = vperm.xlu0 %1501, %v368_v5   ;;  %v748_v34 = vld [vmem:[%s1890_s6 + $0x68] sm:$0xff]  ;;  %v749_v35 = vld [vmem:[%s1890_s6 + $0x70] sm:$0xff]  ;;  %v750_v36 = vld [vmem:[%s1890_s6 + $0x78] sm:$0xff]  ;;  %s1229_s16 = sshll.u32 %s1753_s29, 2 }
  0x14   : > { %430 = vperm.xlu1 %1503, %v366_v4   ;;  %v1058_v37 = vld [vmem:[%s1892_s8] sm:$0x7]  ;;  %s355_s19 = scalar_lea.vmem %s1884_s0, %s1229_s16  ;;  %v518_v47 = vld [vmem:[%s1887_s3 + $0x8] sm:$0xff]  ;;  %s363_s26 = scalar_lea.vmem %s1893_s9, %s1229_s16 }
  0x15   : > { %v364_v52 = vld [vmem:[%s355_s19] sm:$0xf] }
  0x16   : > { %v396_v53 = vrot.slane %v364_v52, %v395_v49  ;;  %v444_v54 = vrot.slane %v364_v52, %v443_v50  ;;  %v472_v61 = vrot.slane %v364_v52, %v471_v55  ;;  %v520_v49 = vld [vmem:[%s1887_s3 + $0x18] sm:$0xff]  ;;  %v521_v50 = vld [vmem:[%s1887_s3 + $0x20] sm:$0xff] }
  0x17   : > { %413 = vperm.xlu0 %1501, %v371_v7  }
  0x18   : > { %1504 = vset.pattern.permute.xlu1 %v1555_v2 }
  0x19   : > { %385 = vperm.xlu1 %1504, %v367_v8  }
  0x1b   : > { %1506 = vset.pattern.permute.xlu0 %v1556_v6 }
  0x1c   : > { %426 = vperm.xlu0 %1506, %v365_v1  }
  0x1d   : > { %1505 = vset.pattern.permute.xlu1 %v1557_v9 }
  0x1e   : > { %454 = vperm.xlu1 %1505, %v365_v1  }
  0x20   : > { %434 = vperm.xlu0 %1506, %v367_v8  }
  0x22   : > { %458 = vperm.xlu1 %1505, %v366_v4  }
  0x24   : > { %1510 = vset.pattern.permute.xlu0 %v1558_v10 }
  0x25   : > { %486 = vperm.xlu0 %1510, %v366_v4  }
  0x26   : > { %1507 = vset.pattern.permute.xlu1 %v1555_v2 }
  0x27   : > { %418 = vperm.xlu1 %1507, %v372_v11  }
  0x29   : > { %490 = vperm.xlu0 %1510, %v367_v8  }
  0x2b   : > { %1508 = vset.pattern.permute.xlu1 %v1556_v6 }
  0x2c   : > { %438 = vperm.xlu1 %1508, %v368_v5  }
  0x2d   : > { %1513 = vset.pattern.permute.xlu0 %v1555_v2 }
  0x2e   : > { %535 = vperm.xlu0 %1513, %v525_v14  }
  0x30   : > { %1509 = vset.pattern.permute.xlu1 %v1558_v10 }
  0x31   : > { %482 = vperm.xlu1 %1509, %v365_v1  }
  0x32   : > { %550 = vperm.xlu0 %1513, %v528_v16  }
  0x35   : > { %1511 = vset.pattern.permute.xlu1 %v1557_v9 }
  0x36   : > { %462 = vperm.xlu1 %1511, %v367_v8   ;;  %560 = vperm.xlu0 %1513, %v530_v18  }
  0x3a   : > { %466 = vperm.xlu1 %1511, %v368_v5   ;;  %570 = vperm.xlu0 %1513, %v532_v20  }
  0x3e   : > { %1512 = vset.pattern.permute.xlu1 %v1558_v10  ;;  %758 = vperm.xlu0 %1513, %v736_v22  }
  0x3f   : > { %494 = vperm.xlu1 %1512, %v368_v5  }
  0x42   : > { %768 = vperm.xlu0 %1513, %v738_v24  }
  0x43   : > { %1514 = vset.pattern.permute.xlu1 %v1555_v2  ;;  %v500_v2 = vrot.slane %v364_v52, %v499_v59  ;;  %v523_v52 = vld [vmem:[%s1887_s3 + $0x30] sm:$0xff] }
  0x44   : > { %540 = vperm.xlu1 %1514, %v526_v13  }
  0x46   : > { %778 = vperm.xlu0 %1513, %v740_v26  }
  0x48   : > { %545 = vperm.xlu1 %1514, %v527_v15  }
  0x4a   : > { %788 = vperm.xlu0 %1513, %v742_v28  }
  0x4c   : > { %555 = vperm.xlu1 %1514, %v529_v17  }
  0x4e   : > { %798 = vperm.xlu0 %1513, %v744_v30  }
  0x50   : > { %565 = vperm.xlu1 %1514, %v531_v19  }
  0x52   : > { %808 = vperm.xlu0 %1513, %v746_v32  }
  0x54   : > { %753 = vperm.xlu1 %1514, %v735_v21  }
  0x56   : > { %818 = vperm.xlu0 %1513, %v748_v34  }
  0x58   : > { %763 = vperm.xlu1 %1514, %v737_v23  }
  0x5a   : > { %828 = vperm.xlu0 %1513, %v750_v36  }
  0x5c   : > { %773 = vperm.xlu1 %1514, %v739_v25  }
  0x60   : > { %783 = vperm.xlu1 %1514, %v741_v27  }
  0x64   : > { %793 = vperm.xlu1 %1514, %v743_v29  }
  0x68   : > { %803 = vperm.xlu1 %1514, %v745_v31  }
  0x6c   : > { %813 = vperm.xlu1 %1514, %v747_v33  }
  0x70   : > { %823 = vperm.xlu1 %1514, %v749_v35  }
  0x74   : > { %1061 = vperm.xlu1 %1514, %v1058_v37  }
  0x8a   : > { %v404_v38 = vpop.permute.xlu1 %403  ;;  %v376_v39 = vpop.permute.xlu0 %375 }
  0x8b   : > { %v397_v63 = vmul.f32 %v396_v53, %v376_v39 }
  0x8d   : > { %v421_v6 = vadd.f32 %v404_v38, %v397_v63 }
  0x8e   : > { %v409_v40 = vpop.permute.xlu1 %408  ;;  %v381_v41 = vpop.permute.xlu0 %380 }
  0x8f   : > { %v398_v58 = vmul.f32 %v396_v53, %v381_v41 }
  0x91   : > { %v422_v0 = vadd.f32 %v409_v40, %v398_v58 }
  0x92   : > { %v391_v42 = vpop.permute.xlu0 %390 }
  0x93   : > { %v431_v43 = vpop.permute.xlu1 %430  ;;  %v400_v28 = vmul.f32 %v396_v53, %v391_v42 }
  0x94   : > { %v446_v60 = vmul.f32 %v444_v54, %v431_v43 }
  0x96   : > { %v414_v45 = vpop.permute.xlu0 %413  ;;  %v450_v4 = vadd.f32 %v446_v60, %v422_v0 }
  0x98   : > { %v386_v46 = vpop.permute.xlu1 %385 }
  0x99   : > { %v399_v14 = vmul.f32 %v396_v53, %v386_v46  ;;  %v524_v53 = vld [vmem:[%s1887_s3 + $0x38] sm:$0xff] }
  0x9b   : > { %v427_v48 = vpop.permute.xlu0 %426  ;;  %v423_v20 = vadd.f32 %v414_v45, %v399_v14 }
  0x9c   : > { %v445_v5 = vmul.f32 %v444_v54, %v427_v48  ;;  %v519_v48 = vld [vmem:[%s1887_s3 + $0x10] sm:$0xff] }
  0x9d   : > { %v455_v51 = vpop.permute.xlu1 %454 }
  0x9e   : > { %v449_v10 = vadd.f32 %v445_v5, %v421_v6  ;;  %v473_v11 = vmul.f32 %v472_v61, %v455_v51  ;;  %v522_v51 = vld [vmem:[%s1887_s3 + $0x28] sm:$0xff] }
  0x9f   : > { %v435_v57 = vpop.permute.xlu0 %434 }
  0xa0   : > { %v477_v15 = vadd.f32 %v473_v11, %v449_v10  ;;  %v447_v17 = vmul.f32 %v444_v54, %v435_v57 }
  0xa1   : > { %v459_v56 = vpop.permute.xlu1 %458 }
  0xa2   : > { %v474_v1 = vmul.f32 %v472_v61, %v459_v56  ;;  %v451_v25 = vadd.f32 %v447_v17, %v423_v20 }
  0xa4   : > { %v487_v3 = vpop.permute.xlu0 %486  ;;  %v478_v7 = vadd.f32 %v474_v1, %v450_v4 }
  0xa5   : > { %v502_v8 = vmul.f32 %v500_v2, %v487_v3 }
  0xa6   : > { %v419_v62 = vpop.permute.xlu1 %418 }
  0xa7   : > { %v506_v12 = vadd.f32 %v502_v8, %v478_v7  ;;  %v424_v34 = vadd.f32 %v419_v62, %v400_v28 }
  0xa8   : > { %v491_v24 = vpop.permute.xlu0 %490 }
  0xa9   : > { %v510_v18 = vmul.f32 0.2, %v506_v12  ;;  %v503_v31 = vmul.f32 %v500_v2, %v491_v24 }
  0xab   : > { %v439_v9 = vpop.permute.xlu1 %438  ;;  %v514_v27 = vmax.f32 %v506_v12, %v510_v18 }
  0xac   : > { %v448_v29 = vmul.f32 %v444_v54, %v439_v9  ;;  %v719_v54 = vld [vmem:[%s1889_s5] sm:$0xff] }
  0xad   : > { %1347 = vmatprep.mubr.msk.f32.mxu1 %vm831_vm1, %v719_v54  ;;  %v536_v55 = vpop.permute.xlu0 %535 }
  0xae   : > { %v452_v36 = vadd.f32 %v448_v29, %v424_v34 }
  0xb0   : > { %v483_v13 = vpop.permute.xlu1 %482 }
  0xb1   : > { %v501_v16 = vmul.f32 %v500_v2, %v483_v13  ;;  %v551_v57 = vpop.permute.xlu0 %550 }
  0xb3   : > { %v505_v19 = vadd.f32 %v501_v16, %v477_v15 }
  0xb5   : > { %v509_v21 = vmul.f32 0.2, %v505_v19  ;;  %v463_v22 = vpop.permute.xlu1 %462  ;;  %v561_v5 = vpop.permute.xlu0 %560 }
  0xb6   : > { %v475_v23 = vmul.f32 %v472_v61, %v463_v22 }
  0xb7   : > { %v513_v26 = vmax.f32 %v505_v19, %v509_v21 }
  0xb8   : > { %v479_v30 = vadd.f32 %v475_v23, %v451_v25 }
  0xb9   : > { %v467_v32 = vpop.permute.xlu1 %466  ;;  %v1406_v33 = vpack.c.bf16 %v514_v27, %v513_v26  ;;  %v571_v19 = vpop.permute.xlu0 %570 }
  0xba   : > { %v476_v35 = vmul.f32 %v472_v61, %v467_v32  ;;  %v507_v37 = vadd.f32 %v503_v31, %v479_v30 }
  0xbb   : > { %1407 = vmatprep.subr.bf16.mxu0 %v1406_v33 }
  0xbc   : > { %1409 = vmatpush3.bf16.msra.mxu0 %v1406_v33  ;;  %v480_v39 = vadd.f32 %v476_v35, %v452_v36  ;;  %v511_v41 = vmul.f32 0.2, %v507_v37  ;;  %v720_v35 = vld [vmem:[%s1889_s5 + $0x8] sm:$0xff]  ;;  %v721_v36 = vld [vmem:[%s1889_s5 + $0x10] sm:$0xff] }
  0xbe   : > { %v495_v38 = vpop.permute.xlu1 %494  ;;  %v515_v45 = vmax.f32 %v507_v37, %v511_v41  ;;  %v722_v37 = vld [vmem:[%s1889_s5 + $0x18] sm:$0xff] }
  0xbf   : > { %v504_v40 = vmul.f32 %v500_v2, %v495_v38  ;;  %v723_v38 = vld [vmem:[%s1889_s5 + $0x20] sm:$0xff]  ;;  %v726_v41 = vld [vmem:[%s1889_s5 + $0x38] sm:$0xff] }
  0xc1   : > { %v508_v43 = vadd.f32 %v504_v40, %v480_v39  ;;  %v724_v39 = vld [vmem:[%s1889_s5 + $0x28] sm:$0xff]  ;;  %v725_v40 = vld [vmem:[%s1889_s5 + $0x30] sm:$0xff] }
  0xc3   : > { %v512_v44 = vmul.f32 0.2, %v508_v43  ;;  %v541_v56 = vpop.permute.xlu1 %540 }
  0xc5   : > { %v516_v46 = vmax.f32 %v508_v43, %v512_v44  ;;  %v727_v43 = vld [vmem:[%s1889_s5 + $0x40] sm:$0xff]  ;;  %v728_v44 = vld [vmem:[%s1889_s5 + $0x48] sm:$0xff] }
  0xc7   : > { %v1410_v42 = vpack.c.bf16 %v516_v46, %v515_v45  ;;  %v546_v59 = vpop.permute.xlu1 %545  ;;  %v729_v45 = vld [vmem:[%s1889_s5 + $0x50] sm:$0xff]  ;;  %v730_v46 = vld [vmem:[%s1889_s5 + $0x58] sm:$0xff] }
  0xc9   : > { %1411 = vmatprep.subr.bf16.mxu0 %v1410_v42 }
  0xca   : > { %1413 = vmatpush3.bf16.msra.mxu0 %v1410_v42  ;;  %v731_v42 = vld [vmem:[%s1889_s5 + $0x60] sm:$0xff] }
  0xcb   : > { %v556_v8 = vpop.permute.xlu1 %555 }
  0xcd   : > { %1320 = vmatmul.mubr.msk.f32.vlgmr.msra.gmra.mrb[0].mxu0 %vm573_vm0, %v518_v47  ;;  %v732_v47 = vld [vmem:[%s1889_s5 + $0x68] sm:$0xff] }
  0xce   : > { %1322 = vmatprep.mubr.msk.f32.mxu0 %vm573_vm0, %v519_v48  ;;  %v733_v48 = vld [vmem:[%s1889_s5 + $0x70] sm:$0xff] }
  0xcf   : > { %v566_v23 = vpop.permute.xlu1 %565 }
  0xd1   : > { %1323 = vmatmul.mubr.msk.f32.gmra.mrb[2].mxu0 %vm573_vm0, %v520_v49  ;;  %v734_v49 = vld [vmem:[%s1889_s5 + $0x78] sm:$0xff] }
  0xd2   : > { %1325 = vmatprep.mubr.msk.f32.mxu0 %vm573_vm0, %v521_v50  ;;  %v1559_v50 = vmov 0.0|0.0  }
  0xd3   : > { %1430 = vmatprep.subr.bf16.mxu0 %v1559_v50 }
  0xd5   : > { %1326 = vmatmul.mubr.msk.f32.gmra.mrb[4].mxu0 %vm573_vm0, %v522_v51  ;;  %v1561_v51 = vmov 0.0  }
  0xd6   : > { %1328 = vmatprep.mubr.msk.f32.mxu0 %vm573_vm0, %v523_v52  ;;  %v759_v52 = vpop.permute.xlu0 %758 }
  0xd9   : > { %1329 = vmatmul.mubr.msk.f32.gmra.mrb[6].mxu0 %vm573_vm0, %v524_v53  ;;  %v754_v53 = vpop.permute.xlu1 %753 }
  0xda   : > { %1403 = vmatprep.mubr.msk.f32.mxu0 %vm1560_vm2, %v1561_v51  ;;  %v769_v54 = vpop.permute.xlu0 %768 }
 0x1a0   : > { %v1321_v58 = vpop.f32.mrb[0].mxu0 }
 0x1a1   : > { %v670_v60 = vadd.f32 %v1321_v58, %v541_v56  ;;  %v664_v61 = vpop.f32.mrb[1].mxu0  ;;  %v779_v56 = vpop.permute.xlu0 %778 }
 0x1a2   : > { %v665_v62 = vadd.f32 %v664_v61, %v536_v55  ;;  %v764_v55 = vpop.permute.xlu1 %763 }
 0x1a3   : > { %v704_v63 = vmul.f32 0.2, %v670_v60 }
 0x1a4   : > { %v703_v0 = vmul.f32 0.2, %v665_v62  ;;  %v1324_v1 = vpop.f32.mrb[2].mxu0 }
 0x1a5   : > { %v712_v2 = vmax.f32 %v670_v60, %v704_v63  ;;  %v680_v3 = vadd.f32 %v1324_v1, %v551_v57  ;;  %v674_v4 = vpop.f32.mrb[3].mxu0  ;;  %v789_v63 = vpop.permute.xlu0 %788 }
 0x1a6   : > { %v711_v6 = vmax.f32 %v665_v62, %v703_v0  ;;  %v675_v7 = vadd.f32 %v674_v4, %v546_v59  ;;  %v774_v57 = vpop.permute.xlu1 %773 }
 0x1a7   : > { %v706_v9 = vmul.f32 0.2, %v680_v3 }
 0x1a8   : > { %v705_v10 = vmul.f32 0.2, %v675_v7  ;;  %v1327_v11 = vpop.f32.mrb[4].mxu0  ;;  %v1414_v12 = vpack.c.bf16 %v712_v2, %v711_v6 }
 0x1a9   : > { %v714_v13 = vmax.f32 %v680_v3, %v706_v9  ;;  %v690_v14 = vadd.f32 %v1327_v11, %v561_v5  ;;  %v684_v15 = vpop.f32.mrb[5].mxu0 }
 0x1aa   : > { %v713_v16 = vmax.f32 %v675_v7, %v705_v10  ;;  %v685_v17 = vadd.f32 %v684_v15, %v556_v8  ;;  %1415 = vmatprep.subr.bf16.mxu1 %v1414_v12  ;;  %v784_v2 = vpop.permute.xlu1 %783  ;;  %v799_v15 = vpop.permute.xlu0 %798 }
 0x1ab   : > { %v708_v18 = vmul.f32 0.2, %v690_v14  ;;  %1417 = vmatpush3.bf16.msra.mxu1 %v1414_v12 }
 0x1ac   : > { %v707_v20 = vmul.f32 0.2, %v685_v17  ;;  %v1330_v21 = vpop.f32.mrb[6].mxu0  ;;  %v1418_v22 = vpack.c.bf16 %v714_v13, %v713_v16 }
 0x1ad   : > { %v716_v24 = vmax.f32 %v690_v14, %v708_v18  ;;  %v700_v25 = vadd.f32 %v1330_v21, %v571_v19  ;;  %v694_v26 = vpop.f32.mrb[7].mxu0 }
 0x1ae   : > { %v715_v27 = vmax.f32 %v685_v17, %v707_v20  ;;  %v695_v28 = vadd.f32 %v694_v26, %v566_v23  ;;  %1419 = vmatprep.subr.bf16.mxu1 %v1418_v22  ;;  %v794_v18 = vpop.permute.xlu1 %793 }
 0x1af   : > { %v710_v29 = vmul.f32 0.2, %v700_v25  ;;  %1421 = vmatpush3.bf16.msra.mxu1 %v1418_v22 }
 0x1b0   : > { %v709_v30 = vmul.f32 0.2, %v695_v28  ;;  %v1422_v31 = vpack.c.bf16 %v716_v24, %v715_v27 }
 0x1b1   : > { %v718_v32 = vmax.f32 %v700_v25, %v710_v29  ;;  %v809_v29 = vpop.permute.xlu0 %808 }
 0x1b2   : > { %v717_v33 = vmax.f32 %v695_v28, %v709_v30  ;;  %1423 = vmatprep.subr.bf16.mxu1 %v1422_v31 }
 0x1b3   : > { %1425 = vmatpush3.bf16.msra.mxu1 %v1422_v31 }
 0x1b4   : > { %v1426_v34 = vpack.c.bf16 %v718_v32, %v717_v33  ;;  %v804_v33 = vpop.permute.xlu1 %803 }
 0x1b6   : > { %1427 = vmatprep.subr.bf16.mxu1 %v1426_v34 }
 0x1b7   : > { %1429 = vmatpush3.bf16.msra.mxu1 %v1426_v34 }
 0x1ba   : > { %1348 = vmatmul.mubr.msk.f32.vlgmr.msra.gmra.mrb[0].mxu1 %vm831_vm1, %v720_v35 }
 0x1bb   : > { %1350 = vmatprep.mubr.msk.f32.mxu1 %vm831_vm1, %v721_v36 }
 0x1be   : > { %1351 = vmatmul.mubr.msk.f32.gmra.mrb[2].mxu1 %vm831_vm1, %v722_v37 }
 0x1bf   : > { %1353 = vmatprep.mubr.msk.f32.mxu1 %vm831_vm1, %v723_v38 }
 0x1c2   : > { %1354 = vmatmul.mubr.msk.f32.gmra.mrb[4].mxu1 %vm831_vm1, %v724_v39 }
 0x1c3   : > { %1356 = vmatprep.mubr.msk.f32.mxu1 %vm831_vm1, %v725_v40 }
 0x1c6   : > { %1357 = vmatmul.mubr.msk.f32.gmra.mrb[6].mxu1 %vm831_vm1, %v726_v41 }
 0x1c7   : > { %1359 = vmatprep.mubr.msk.f32.mxu1 %vm831_vm1, %v727_v43 }
 0x1ca   : > { %1360 = vmatmul.mubr.msk.f32.gmra.mrb[8].mxu1 %vm831_vm1, %v728_v44 }
 0x1cb   : > { %1362 = vmatprep.mubr.msk.f32.mxu1 %vm831_vm1, %v729_v45 }
 0x1ce   : > { %1363 = vmatmul.mubr.msk.f32.gmra.mrb[10].mxu1 %vm831_vm1, %v730_v46 }
 0x1cf   : > { %1365 = vmatprep.mubr.msk.f32.mxu1 %vm831_vm1, %v731_v42  ;;  %v819_v42 = vpop.permute.xlu0 %818 }
 0x1d2   : > { %1366 = vmatmul.mubr.msk.f32.gmra.mrb[12].mxu1 %vm831_vm1, %v732_v47 }
 0x1d3   : > { %1368 = vmatprep.mubr.msk.f32.mxu1 %vm831_vm1, %v733_v48 }
 0x1d6   : > { %1369 = vmatmul.mubr.msk.f32.gmra.mrb[14].mxu1 %vm831_vm1, %v734_v49  ;;  %v814_v49 = vpop.permute.xlu1 %813 }
 0x28d   : > { %v1349_v58 = vpop.f32.mrb[0].mxu1 }
 0x28e   : > { %v952_v59 = vadd.f32 %v1349_v58, %v759_v52  ;;  %v946_v60 = vpop.f32.mrb[1].mxu1 }
 0x28f   : > { %v947_v61 = vadd.f32 %v946_v60, %v754_v53 }
 0x290   : > { %v1026_v62 = vmul.f32 0.2, %v952_v59 }
 0x291   : > { %v1025_v0 = vmul.f32 0.2, %v947_v61  ;;  %v1352_v1 = vpop.f32.mrb[2].mxu1 }
 0x292   : > { %v1042_v3 = vmax.f32 %v952_v59, %v1026_v62  ;;  %v962_v4 = vadd.f32 %v1352_v1, %v769_v54  ;;  %v956_v5 = vpop.f32.mrb[3].mxu1  ;;  %v824_v1 = vpop.permute.xlu1 %823 }
 0x293   : > { %v1041_v6 = vmax.f32 %v947_v61, %v1025_v0  ;;  %v957_v7 = vadd.f32 %v956_v5, %v764_v55  ;;  %v829_v61 = vpop.permute.xlu0 %828 }
 0x294   : > { %v1028_v8 = vmul.f32 0.2, %v962_v4 }
 0x295   : > { %v1431_v9 = vpack.c.bf16 %v1042_v3, %v1041_v6  ;;  %v1027_v10 = vmul.f32 0.2, %v957_v7  ;;  %v1355_v11 = vpop.f32.mrb[4].mxu1 }
 0x296   : > { %v1044_v12 = vmax.f32 %v962_v4, %v1028_v8  ;;  %v972_v13 = vadd.f32 %v1355_v11, %v779_v56  ;;  %v966_v14 = vpop.f32.mrb[5].mxu1 }
 0x297   : > { %v1043_v16 = vmax.f32 %v957_v7, %v1027_v10  ;;  %v967_v17 = vadd.f32 %v966_v14, %v774_v57  ;;  %1432 = vmatpush3.bf16.msra.mxu0 %v1431_v9  ;;  %v1062_v14 = vpop.permute.xlu1 %1061 }
 0x298   : > { %v1030_v19 = vmul.f32 0.2, %v972_v13  ;;  %1433 = vmatprep.subr.bf16.mxu0 %v1559_v50 }
 0x299   : > { %v1434_v20 = vpack.c.bf16 %v1044_v12, %v1043_v16  ;;  %v1029_v21 = vmul.f32 0.2, %v967_v17  ;;  %v1358_v22 = vpop.f32.mrb[6].mxu1 }
 0x29a   : > { %v1046_v23 = vmax.f32 %v972_v13, %v1030_v19  ;;  %v982_v24 = vadd.f32 %v1358_v22, %v789_v63  ;;  %v976_v25 = vpop.f32.mrb[7].mxu1  ;;  %v1057_v13 = vld [vmem:[%s1891_s7] sm:$0x7] }
 0x29b   : > { %v1045_v26 = vmax.f32 %v967_v17, %v1029_v21  ;;  %v977_v27 = vadd.f32 %v976_v25, %v784_v2  ;;  %1435 = vmatpush3.bf16.msra.mxu0 %v1434_v20 }
 0x29c   : > { %v1032_v28 = vmul.f32 0.2, %v982_v24  ;;  %1436 = vmatprep.subr.bf16.mxu0 %v1559_v50 }
 0x29d   : > { %v1437_v30 = vpack.c.bf16 %v1046_v23, %v1045_v26  ;;  %v1031_v31 = vmul.f32 0.2, %v977_v27  ;;  %v1361_v32 = vpop.f32.mrb[8].mxu1 }
 0x29e   : > { %v1048_v34 = vmax.f32 %v982_v24, %v1032_v28  ;;  %v992_v35 = vadd.f32 %v1361_v32, %v799_v15  ;;  %v986_v36 = vpop.f32.mrb[9].mxu1 }
 0x29f   : > { %v1047_v37 = vmax.f32 %v977_v27, %v1031_v31  ;;  %v987_v38 = vadd.f32 %v986_v36, %v794_v18  ;;  %1438 = vmatpush3.bf16.msra.mxu0 %v1437_v30 }
 0x2a0   : > { %v1034_v39 = vmul.f32 0.2, %v992_v35  ;;  %1439 = vmatprep.subr.bf16.mxu0 %v1559_v50 }
 0x2a1   : > { %v1440_v40 = vpack.c.bf16 %v1048_v34, %v1047_v37  ;;  %v1033_v41 = vmul.f32 0.2, %v987_v38  ;;  %v1364_v43 = vpop.f32.mrb[10].mxu1 }
 0x2a2   : > { %v1050_v44 = vmax.f32 %v992_v35, %v1034_v39  ;;  %v1002_v45 = vadd.f32 %v1364_v43, %v809_v29  ;;  %v996_v46 = vpop.f32.mrb[11].mxu1 }
 0x2a3   : > { %v1049_v47 = vmax.f32 %v987_v38, %v1033_v41  ;;  %v997_v48 = vadd.f32 %v996_v46, %v804_v33  ;;  %1441 = vmatpush3.bf16.msra.mxu0 %v1440_v40 }
 0x2a4   : > { %v1036_v51 = vmul.f32 0.2, %v1002_v45  ;;  %1442 = vmatprep.subr.bf16.mxu0 %v1559_v50 }
 0x2a5   : > { %v1443_v52 = vpack.c.bf16 %v1050_v44, %v1049_v47  ;;  %v1035_v53 = vmul.f32 0.2, %v997_v48  ;;  %v1367_v54 = vpop.f32.mrb[12].mxu1 }
 0x2a6   : > { %v1052_v55 = vmax.f32 %v1002_v45, %v1036_v51  ;;  %v1012_v56 = vadd.f32 %v1367_v54, %v819_v42  ;;  %v1006_v57 = vpop.f32.mrb[13].mxu1 }
 0x2a7   : > { %v1051_v58 = vmax.f32 %v997_v48, %v1035_v53  ;;  %v1007_v59 = vadd.f32 %v1006_v57, %v814_v49  ;;  %1444 = vmatpush3.bf16.msra.mxu0 %v1443_v52 }
 0x2a8   : > { %v1038_v60 = vmul.f32 0.2, %v1012_v56  ;;  %1445 = vmatprep.subr.bf16.mxu0 %v1559_v50 }
 0x2a9   : > { %v1446_v62 = vpack.c.bf16 %v1052_v55, %v1051_v58  ;;  %v1037_v63 = vmul.f32 0.2, %v1007_v59  ;;  %v1370_v0 = vpop.f32.mrb[14].mxu1 }
 0x2aa   : > { %v1054_v2 = vmax.f32 %v1012_v56, %v1038_v60  ;;  %v1022_v3 = vadd.f32 %v1370_v0, %v829_v61  ;;  %v1016_v4 = vpop.f32.mrb[15].mxu1 }
 0x2ab   : > { %v1053_v5 = vmax.f32 %v1007_v59, %v1037_v63  ;;  %v1017_v6 = vadd.f32 %v1016_v4, %v824_v1  ;;  %1447 = vmatpush3.bf16.msra.mxu0 %v1446_v62 }
 0x2ac   : > { %v1040_v7 = vmul.f32 0.2, %v1022_v3  ;;  %1448 = vmatprep.subr.bf16.mxu0 %v1559_v50 }
 0x2ad   : > { %v1449_v8 = vpack.c.bf16 %v1054_v2, %v1053_v5  ;;  %v1039_v9 = vmul.f32 0.2, %v1017_v6 }
 0x2ae   : > { %v1056_v10 = vmax.f32 %v1022_v3, %v1040_v7 }
 0x2af   : > { %v1055_v11 = vmax.f32 %v1017_v6, %v1039_v9  ;;  %1450 = vmatpush3.bf16.msra.mxu0 %v1449_v8 }
 0x2b0   : > { %1451 = vmatprep.subr.bf16.mxu0 %v1559_v50 }
 0x2b1   : > { %v1452_v12 = vpack.c.bf16 %v1056_v10, %v1055_v11 }
 0x2b3   : > { %1453 = vmatpush3.bf16.msra.mxu0 %v1452_v12 }
 0x2b6   : > { %1404 = vmatmul.mubr.f32.vlgmr.msra.gmra.mrb[8].mxu0 %v1057_v13 }
 0x389   : > { %v1130_v15 = vpop.f32.mrb[8].mxu0 }
 0x38a   : > { %v1131_v16 = vadd.f32 %v1130_v15, %v1062_v14  ;;  %v1405_v17 = vpop.f32.mrb[9].mxu0 }
 0x38c   : > { %v1134_v18 = vmax.f32 %v1131_v16, 0.0 }
 0x38e   : > { %v1135_v19 = vmin.f32 %v1134_v18, 1.0 }
 0x390   : > { %1136 = vst [vmem:[%s363_s26] sm:$0x7] %v1135_v19 }
 0x391 PF: > { %s19_s13 = sadd.s32 1, %s1553_s13   ;;  %s1894_s30 = smov %s1545_s11 }
 0x392   : > { %p16_p7 = scmp.ge.s32.totalorder %s19_s13, 6   ;;  %s1895_s10 = smov %s1549_s12 }
 0x393   : > { %s1896_s11 = smov %s1899_s14  ;;  %s1897_s12 = smov %s1903_s15 }
 0x394   :  { %18 = sbr.rel (!%p16_p7) target bundleno = 3 (0x3), region = 86 }

</bundles_post_ra>
